<compile_context>
chip_gen: v7x
topology: tpu7x:2x2x1
jax: 0.10.0
libtpu: 0.0.40
codegen_flags: <defaults>
</compile_context>

<pallas_src>
import functools

import jax
import jax.numpy as jnp
from jax.experimental import pallas as pl
from jax.experimental.pallas import tpu as pltpu


_MAX_COLS = 8192            # lane-dim cap for the flat (rows, cols) factorization
_MAX_INFLIGHT = 4           # max DMAs in flight in the copy kernel
_MIN_CHUNK_BYTES = 1 << 20  # don't split the copy below ~1 MiB per DMA


def _resolve_shape(total, target_shape):
    """torch.Tensor.view semantics: resolve a single -1 and validate."""
    target_shape = list(target_shape)
    if -1 in target_shape:
        known = 1
        for d in target_shape:
            if d != -1:
                known *= d
        target_shape[target_shape.index(-1)] = total // max(known, 1)
    prod = 1
    for d in target_shape:
        prod *= d
    assert prod == total, "view(): shape is invalid for input size"
    return tuple(target_shape)


def _hbm_copy_kernel(x_hbm, o_hbm, sems, *, row_splits):
    # Direct HBM -> HBM DMAs.  All chunks are issued back-to-back (each with
    # its own semaphore, so up to len(row_splits) copies are in flight using
    # the DMA engines only), then waited.  No VMEM round trip.
    copies = []
    for k, (start, size) in enumerate(row_splits):
        cp = pltpu.make_async_copy(
            x_hbm.at[pl.ds(start, size), :],
            o_hbm.at[pl.ds(start, size), :],
            sems.at[k],
        )
        cp.start()
        copies.append(cp)
    for cp in copies:
        cp.wait()


def pallas_reshape(x, target_shape, *, force_copy=False):
    """Equivalent of torch.Tensor.view(target_shape) (row-major, contiguous).

    Default: metadata-only reshape (0 HBM bytes), matching torch.view
    semantics exactly.  force_copy=True materializes a physical copy via a
    Pallas HBM->HBM DMA kernel.
    """
    total = int(x.size)
    target_shape = _resolve_shape(total, target_shape)
    itemsize = jnp.dtype(x.dtype).itemsize

    if not force_copy:
        # Highest-value optimization: a contiguous view is free.
        return x.reshape(target_shape)

    # Physical copy requested.  Non-lane-aligned totals and 64-bit dtypes
    # take the free reshape instead of an awkward DMA layout.
    if total == 0 or total % 128 != 0 or itemsize == 8:
        return x.reshape(target_shape)

    # Lane-aligned flat factorization: total = rows * cols, cols % 128 == 0.
    cols = 128
    c = 128
    while c <= min(total, _MAX_COLS):
        if total % c == 0:
            cols = c
        c += 128
    rows = total // cols
    flat = x.reshape(rows, cols)  # free (metadata-only) relabel

    # Split rows into up to _MAX_INFLIGHT chunks (each >= ~1 MiB), with chunk
    # boundaries aligned to the dtype's sublane pack.
    pack = {4: 8, 2: 16, 1: 32}.get(itemsize, 8)
    bytes_total = total * itemsize
    n_chunks = int(min(_MAX_INFLIGHT, max(1, bytes_total // _MIN_CHUNK_BYTES)))
    base = -(-rows // n_chunks)            # cdiv
    base = -(-base // pack) * pack         # round up to sublane pack
    row_splits = []
    start = 0
    while start < rows:
        size = min(base, rows - start)
        row_splits.append((start, size))
        start += size

    out_flat = pl.pallas_call(
        functools.partial(_hbm_copy_kernel, row_splits=tuple(row_splits)),
        out_shape=jax.ShapeDtypeStruct((rows, cols), x.dtype),
        in_specs=[pl.BlockSpec(memory_space=pl.ANY)],
        out_specs=pl.BlockSpec(memory_space=pl.ANY),
        scratch_shapes=[pltpu.SemaphoreType.DMA((len(row_splits),))],
        cost_estimate=pl.CostEstimate(
            flops=0, transcendentals=0, bytes_accessed=2 * bytes_total),
    )(flat)

    # Relabel the contiguous output buffer with the requested shape (free).
    return out_flat.reshape(target_shape)


class Reshape:
    """JAX/Pallas equivalent of the PyTorch Reshape nn.Module."""

    def __init__(self, shape):
        self.shape = tuple(shape)

    def __call__(self, x):
        return pallas_reshape(x, self.shape)


if __name__ == "__main__":
    key = jax.random.PRNGKey(0)

    # Typical VAE usage: NCHW -> (N, C*H*W) flatten via Reshape((2, -1)).
    x = jax.random.normal(key, (2, 4, 16, 16), dtype=jnp.float32)
    mod = Reshape((2, -1))

    # Default path: metadata-only view (the correct / fast semantics).
    y = jax.block_until_ready(mod(x))
    ref = x.reshape(2, -1)
    assert y.shape == ref.shape and y.dtype == ref.dtype
    assert bool(jnp.all(y == ref))

    # Run the Pallas HBM->HBM DMA copy kernel once (single-chunk path).
    y_copy = jax.block_until_ready(pallas_reshape(x, (2, -1), force_copy=True))
    assert y_copy.shape == ref.shape and bool(jnp.all(y_copy == ref))

    # -1 case like torch's view(-1, 16), still via the copy kernel.
    y2 = jax.block_until_ready(pallas_reshape(x, (-1, 16), force_copy=True))
    assert bool(jnp.all(y2 == x.reshape(-1, 16)))

    # bf16 path (sub-32-bit sublane pack alignment).
    xb = jax.random.normal(key, (4, 8, 32, 16), dtype=jnp.bfloat16)
    y3 = jax.block_until_ready(pallas_reshape(xb, (4, -1), force_copy=True))
    assert bool(jnp.all(y3 == xb.reshape(4, -1)))

    # Larger tensor (2 MiB) to exercise the multi-DMA (chunked) path.
    x4 = jax.random.normal(key, (2, 4, 256, 256), dtype=jnp.float32)
    y4 = jax.block_until_ready(pallas_reshape(x4, (2, -1), force_copy=True))
    assert bool(jnp.all(y4 == x4.reshape(2, -1)))

    # Non-lane-aligned size -> metadata-only fallback even when copy requested.
    xr = jax.random.normal(key, (3, 5, 7), dtype=jnp.float32)
    y5 = jax.block_until_ready(pallas_reshape(xr, (-1,), force_copy=True))
    assert bool(jnp.all(y5 == xr.reshape(-1)))

    print("KERNEL_OK")
</pallas_src>

<mosaic_0001>
module attributes {stable_mosaic.version = 11 : i64} {
  func.func @_hbm_copy_kernel(%arg0: memref<1x2048xf32, #tpu.memory_space<any>>, %arg1: memref<1x2048xf32, #tpu.memory_space<any>>, %arg2: memref<1x!tpu.dma_semaphore, #tpu.memory_space<semaphore_mem>>) attributes {dimension_semantics = [], scalar_prefetch = 0 : i64, scratch_operands = 1 : i64, tpu.core_type = #tpu.core_type<tc>} {
    %c0_i32 = arith.constant 0 : i32
    %c0_i32_0 = arith.constant 0 : i32
    %c0_i32_1 = arith.constant 0 : i32
    %0 = tpu.memref_slice %arg0[%c0_i32_0, %c0_i32_1] : memref<1x2048xf32, #tpu.memory_space<any>> -> memref<1x2048xf32, #tpu.memory_space<any>>
    %c0_i32_2 = arith.constant 0 : i32
    %c0_i32_3 = arith.constant 0 : i32
    %1 = tpu.memref_slice %arg1[%c0_i32_2, %c0_i32_3] : memref<1x2048xf32, #tpu.memory_space<any>> -> memref<1x2048xf32, #tpu.memory_space<any>>
    %2 = tpu.memref_slice %arg2[%c0_i32] : memref<1x!tpu.dma_semaphore, #tpu.memory_space<semaphore_mem>> -> memref<1x!tpu.dma_semaphore, #tpu.memory_space<semaphore_mem>>
    %3 = tpu.memref_squeeze %2 : memref<1x!tpu.dma_semaphore, #tpu.memory_space<semaphore_mem>> -> memref<!tpu.dma_semaphore, #tpu.memory_space<semaphore_mem>>
    tpu.enqueue_dma source(%0 : memref<1x2048xf32, #tpu.memory_space<any>>) target(%1 : memref<1x2048xf32, #tpu.memory_space<any>>) target_semaphore(%3 : memref<!tpu.dma_semaphore, #tpu.memory_space<semaphore_mem>>)
    %c0_i32_4 = arith.constant 0 : i32
    %c0_i32_5 = arith.constant 0 : i32
    %c0_i32_6 = arith.constant 0 : i32
    %4 = tpu.memref_slice %arg0[%c0_i32_5, %c0_i32_6] : memref<1x2048xf32, #tpu.memory_space<any>> -> memref<1x2048xf32, #tpu.memory_space<any>>
    %c0_i32_7 = arith.constant 0 : i32
    %c0_i32_8 = arith.constant 0 : i32
    %5 = tpu.memref_slice %arg1[%c0_i32_7, %c0_i32_8] : memref<1x2048xf32, #tpu.memory_space<any>> -> memref<1x2048xf32, #tpu.memory_space<any>>
    %6 = tpu.memref_slice %arg2[%c0_i32_4] : memref<1x!tpu.dma_semaphore, #tpu.memory_space<semaphore_mem>> -> memref<1x!tpu.dma_semaphore, #tpu.memory_space<semaphore_mem>>
    %7 = tpu.memref_squeeze %6 : memref<1x!tpu.dma_semaphore, #tpu.memory_space<semaphore_mem>> -> memref<!tpu.dma_semaphore, #tpu.memory_space<semaphore_mem>>
    tpu.wait_dma2 semaphore(%7 : memref<!tpu.dma_semaphore, #tpu.memory_space<semaphore_mem>>) src(%4 : memref<1x2048xf32, #tpu.memory_space<any>>) dst(%5 : memref<1x2048xf32, #tpu.memory_space<any>>)
    return
  }
}

</mosaic_0001>

<bundles_post_ra>
// kernel: tpu_custom_call.1
= control target key start
LH: loop header
LB: loop body
LE: loop exit
PB: predicated region body
PF: predicated region fallthrough
CT: control target
= control target key end

     0   :  { %s34_s6 = smov [#allocation2]   ;;  %s35_s7 = smov [#allocation3]   ;;  %s53_s0 = inlined_call_operand.hbm [shape: f32[1,2048], index: 0, kind: input, shape index: {}]   ;;  %s54_s1 = inlined_call_operand.hbm [shape: f32[1,2048], index: 1, kind: output, shape index: {}]  }
   0x1   :  { %s36_s8 = smov 0  }
   0x2   :  { %18 = dma.general %s53_s0, 256, %s54_s1, %s34_s6, %s35_s7, [#allocation4], %s36_s8, 0  }
   0x3   :  { %32 = dma.done.wait [#allocation2], 256 }
   0x4   :  { %33 = vsyncadd [#allocation2], 4294967040 }
   0x5   :  { %22 = vsyncmov [#allocation2] }
   0x8   :  { %s23_s13 = vpop.sfrf %22 }
   0x9   :  { %p28_p0 = scmp.ne.s32.totalorder %s23_s13, 0 }
   0xb   :  { %27 = shalt.err (%p28_p0)  }

</bundles_post_ra>
